<compile_context>
chip_gen: v7x
topology: tpu7x:2x2x1
jax: 0.10.0
libtpu: 0.0.40
codegen_flags: <defaults>
</compile_context>

<pallas_src>
import numpy as np
import jax
import jax.numpy as jnp
from jax.experimental import pallas as pl
from jax.experimental.pallas import tpu as pltpu

LN_EPS = 1e-5  # torch.nn.LayerNorm default


# ----------------------------------------------------------------------------
# Packed-parameter layout.
#   wm (bf16, MXU operands):  rows [0, S+A)        -> w1 (state rows, action rows)
#                             rows [r_w2, r_w2+fc1) -> w2
#                             row  r_w3             -> w3 (fc2 values)
#   wv (f32, VPU operands):   rows 0..6 -> b1, g1, be1, b2, g2, be2, b3(col 0)
# ----------------------------------------------------------------------------
def _round_up(x, m):
    return (x + m - 1) // m * m


def _layout(state_dim, action_dim, fc1, fc2):
    width = max(fc1, fc2)
    r_w2 = _round_up(state_dim + action_dim, 16)   # bf16 sublane pack = 16
    r_w3 = _round_up(r_w2 + fc1, 16)
    n_rows = _round_up(r_w3 + 1, 16)
    return width, r_w2, r_w3, n_rows


def pack_params(p, state_dim, action_dim, fc1, fc2):
    """One-time (init-time) packing of all parameters into two small buffers."""
    width, r_w2, r_w3, n_rows = _layout(state_dim, action_dim, fc1, fc2)

    wm = jnp.zeros((n_rows, width), jnp.bfloat16)
    wm = wm.at[0:state_dim + action_dim, :fc1].set(p["w1"].astype(jnp.bfloat16))
    wm = wm.at[r_w2:r_w2 + fc1, :fc2].set(p["w2"].astype(jnp.bfloat16))
    wm = wm.at[r_w3, :fc2].set(p["w3"][:, 0].astype(jnp.bfloat16))

    wv = jnp.zeros((8, width), jnp.float32)
    wv = wv.at[0, :fc1].set(p["b1"])
    wv = wv.at[1, :fc1].set(p["g1"])
    wv = wv.at[2, :fc1].set(p["be1"])
    wv = wv.at[3, :fc2].set(p["b2"])
    wv = wv.at[4, :fc2].set(p["g2"])
    wv = wv.at[5, :fc2].set(p["be2"])
    wv = wv.at[6, 0].set(p["b3"][0])
    return wm, wv


# ----------------------------------------------------------------------------
# Kernel
# ----------------------------------------------------------------------------
def _ln_relu(h, gamma, beta, n):
    """Single-pass LayerNorm (sum / sum-of-squares) followed by ReLU, in f32."""
    inv_n = 1.0 / float(n)
    s1 = jnp.sum(h, axis=-1, keepdims=True)
    s2 = jnp.sum(h * h, axis=-1, keepdims=True)
    mu = s1 * inv_n
    # Clamp: E[x^2] - E[x]^2 can go slightly negative from f32 cancellation.
    var = jnp.maximum(s2 * inv_n - mu * mu, 0.0)
    hn = (h - mu) * jax.lax.rsqrt(var + LN_EPS) * gamma + beta
    return jnp.maximum(hn, 0.0)


def _make_kernel(state_dim, action_dim, fc1, fc2, r_w2, r_w3):
    S, A = state_dim, action_dim

    def critic_kernel(x_ref, y_ref, wm_ref, wv_ref, o_ref):
        xb = x_ref[...].astype(jnp.bfloat16)               # (Bblk, S) bf16 for MXU

        # Static slices of the packed parameter buffers.
        w1s = wm_ref[0:S, :fc1]                            # (S, fc1)   bf16
        w1a = wm_ref[S:S + A, :fc1]                        # (A, fc1)   bf16
        w2 = wm_ref[r_w2:r_w2 + fc1, :fc2]                 # (fc1, fc2) bf16
        w3r = wm_ref[r_w3:r_w3 + 1, :fc2]                  # (1, fc2)   bf16

        b1 = wv_ref[0:1, :fc1]
        g1 = wv_ref[1:2, :fc1]
        be1 = wv_ref[2:3, :fc1]
        b2 = wv_ref[3:4, :fc2]
        g2 = wv_ref[4:5, :fc2]
        be2 = wv_ref[5:6, :fc2]
        b3 = wv_ref[6:7, 0:1]                              # (1, 1)

        # fc1 with the concat fused away: state @ W1_state + action contribution.
        h1 = jnp.dot(xb, w1s, preferred_element_type=jnp.float32)
        if A == 1:
            # action_dim == 1: f32 outer product on the VPU, no degenerate matmul.
            h1 = h1 + y_ref[...] * w1a.astype(jnp.float32)
        else:
            h1 = h1 + jnp.dot(y_ref[...].astype(jnp.bfloat16), w1a,
                              preferred_element_type=jnp.float32)
        h1 = _ln_relu(h1 + b1, g1, be1, fc1)

        # fc2 -> LayerNorm -> ReLU
        h2 = jnp.dot(h1.astype(jnp.bfloat16), w2,
                     preferred_element_type=jnp.float32) + b2
        h2 = _ln_relu(h2, g2, be2, fc2)

        # fc3 as a transposed dot: (1, fc2) . (Bblk, fc2)^T -> (1, Bblk).
        # Batch lands on the lane axis -> lane-dense store.
        q = jax.lax.dot_general(w3r, h2.astype(jnp.bfloat16),
                                (((1,), (1,)), ((), ())),
                                preferred_element_type=jnp.float32)
        o_ref[...] = q + b3

    return critic_kernel


# ----------------------------------------------------------------------------
# Wrapper
# ----------------------------------------------------------------------------
def critic_forward(x, y, packed, *, fc1=64, fc2=64, block_b=4096,
                   vmem_limit_bytes=None):
    """x: (B, state_dim), y: (B, action_dim) -> (B, 1) Q-values.

    block_b=4096 fits the default scoped-VMEM budget on v5e/v6e/v7x; on
    v5e/v6e it can be raised to 8192-16384 together with vmem_limit_bytes.
    """
    B, S = x.shape
    A = y.shape[1]
    width, r_w2, r_w3, n_rows = _layout(S, A, fc1, fc2)
    wm, wv = packed
    assert wm.shape == (n_rows, width) and wv.shape == (8, width)

    kernel = _make_kernel(S, A, fc1, fc2, r_w2, r_w3)

    if B <= block_b:
        # Small batch: no grid, full-extent VMEM blocks for the 4 operands.
        vmem = pl.BlockSpec(memory_space=pltpu.MemorySpace.VMEM)
        q_row = pl.pallas_call(
            kernel,
            out_shape=jax.ShapeDtypeStruct((1, B), jnp.float32),
            in_specs=[vmem, vmem, vmem, vmem],
            out_specs=vmem,
        )(x, y, wm, wv)
        return q_row.reshape(B, 1)

    # Large batch: cdiv grid over the batch axis with a zero-padded tail tile.
    # "parallel" lets v7x's two TensorCores split the steps; the packed weight
    # buffers have constant index_maps and stay resident.
    assert block_b % 128 == 0, "block_b must be a multiple of 128 (lane-dense out)"
    n_blk = pl.cdiv(B, block_b)
    Bp = n_blk * block_b
    if Bp != B:
        x = jnp.pad(x, ((0, Bp - B), (0, 0)))
        y = jnp.pad(y, ((0, Bp - B), (0, 0)))

    cp_kwargs = {"dimension_semantics": ("parallel",)}
    if vmem_limit_bytes is not None:
        cp_kwargs["vmem_limit_bytes"] = vmem_limit_bytes

    q_row = pl.pallas_call(
        kernel,
        out_shape=jax.ShapeDtypeStruct((1, Bp), jnp.float32),
        grid=(n_blk,),
        in_specs=[
            pl.BlockSpec((block_b, S), lambda i: (i, 0)),
            pl.BlockSpec((block_b, A), lambda i: (i, 0)),
            pl.BlockSpec((n_rows, width), lambda i: (0, 0)),
            pl.BlockSpec((8, width), lambda i: (0, 0)),
        ],
        out_specs=pl.BlockSpec((1, block_b), lambda i: (0, i)),
        compiler_params=pltpu.CompilerParams(**cp_kwargs),
    )(x, y, wm, wv)
    return q_row[:, :B].reshape(B, 1)


# ----------------------------------------------------------------------------
# Init (host-side, deterministic) + pure-JAX f32 reference
# ----------------------------------------------------------------------------
def _orthogonal(rng, rows, cols, gain):
    """Same semantics as nn.init.orthogonal_ (host-side QR)."""
    a = rng.standard_normal((max(rows, cols), min(rows, cols))).astype(np.float64)
    q, r = np.linalg.qr(a)
    q = q * np.sign(np.diag(r))[None, :]
    if rows < cols:
        q = q.T
    return (gain * q[:rows, :cols]).astype(np.float32)


def init_params(seed, state_dim, action_dim, fc1_unit=64, fc2_unit=64,
                init_weight_gain=float(np.sqrt(2)), init_bias=0.0):
    rng = np.random.default_rng(seed)
    in_dim = state_dim + action_dim

    # PyTorch fc weight is (out, in); we store transposed (in, out) for x @ W.
    w1 = _orthogonal(rng, fc1_unit, in_dim, init_weight_gain).T       # (in_dim, fc1)
    w2 = _orthogonal(rng, fc2_unit, fc1_unit, init_weight_gain).T     # (fc1, fc2)
    # fc3 keeps torch's default uniform(-1/sqrt(fan_in), 1/sqrt(fan_in)) init.
    bound3 = 1.0 / np.sqrt(fc2_unit)
    w3 = rng.uniform(-bound3, bound3, (fc2_unit, 1)).astype(np.float32)
    b3 = rng.uniform(-bound3, bound3, (1,)).astype(np.float32)

    return {
        "w1": jnp.asarray(w1, jnp.float32),
        "b1": jnp.full((fc1_unit,), init_bias, jnp.float32),
        "g1": jnp.ones((fc1_unit,), jnp.float32),     # LayerNorm gamma
        "be1": jnp.zeros((fc1_unit,), jnp.float32),   # LayerNorm beta
        "w2": jnp.asarray(w2, jnp.float32),
        "b2": jnp.full((fc2_unit,), init_bias, jnp.float32),
        "g2": jnp.ones((fc2_unit,), jnp.float32),
        "be2": jnp.zeros((fc2_unit,), jnp.float32),
        "w3": jnp.asarray(w3, jnp.float32),
        "b3": jnp.asarray(b3, jnp.float32),
    }


def _reference(x, y, p):
    """Pure-JAX f32 reference (two-pass LayerNorm), matching the torch module."""
    def ln(h, g, b):
        mu = jnp.mean(h, axis=-1, keepdims=True)
        var = jnp.mean((h - mu) ** 2, axis=-1, keepdims=True)
        return (h - mu) * jax.lax.rsqrt(var + LN_EPS) * g + b

    h = jnp.concatenate([x, y], axis=1)
    h = jnp.maximum(ln(h @ p["w1"] + p["b1"], p["g1"], p["be1"]), 0.0)
    h = jnp.maximum(ln(h @ p["w2"] + p["b2"], p["g2"], p["be2"]), 0.0)
    return h @ p["w3"] + p["b3"]


if __name__ == "__main__":
    STATE_DIM, ACTION_DIM, FC1, FC2 = 16, 1, 64, 64
    params = init_params(0, STATE_DIM, ACTION_DIM, FC1, FC2)
    packed = pack_params(params, STATE_DIM, ACTION_DIM, FC1, FC2)  # one-time pack

    key = jax.random.PRNGKey(0)
    kx, ky, kx2, ky2 = jax.random.split(key, 4)

    # 1) Small batch -> no-grid full-VMEM path.
    B = 8
    x = jax.random.normal(kx, (B, STATE_DIM), dtype=jnp.float32)    # state
    y = jax.random.normal(ky, (B, ACTION_DIM), dtype=jnp.float32)   # action
    q = jax.block_until_ready(critic_forward(x, y, packed, fc1=FC1, fc2=FC2))
    assert q.shape == (B, 1)
    q_ref = _reference(x, y, params)
    # bf16 MXU operands -> looser tolerance vs. the f32 reference.
    np.testing.assert_allclose(np.asarray(q), np.asarray(q_ref),
                               rtol=5e-2, atol=5e-2)

    # 2) Non-divisible batch -> padded cdiv grid path (3 parallel steps of 128).
    B2 = 300
    x2 = jax.random.normal(kx2, (B2, STATE_DIM), dtype=jnp.float32)
    y2 = jax.random.normal(ky2, (B2, ACTION_DIM), dtype=jnp.float32)
    q2 = jax.block_until_ready(
        critic_forward(x2, y2, packed, fc1=FC1, fc2=FC2, block_b=128))
    assert q2.shape == (B2, 1)
    q2_ref = _reference(x2, y2, params)
    np.testing.assert_allclose(np.asarray(q2), np.asarray(q2_ref),
                               rtol=5e-2, atol=5e-2)

    print("KERNEL_OK")
</pallas_src>

<mosaic_0001>
module attributes {stable_mosaic.version = 11 : i64} {
  func.func @critic_kernel(%arg0: memref<8x16xf32, #tpu.memory_space<vmem>>, %arg1: memref<8x1xf32, #tpu.memory_space<vmem>>, %arg2: memref<112x64xbf16, #tpu.memory_space<vmem>>, %arg3: memref<8x64xf32, #tpu.memory_space<vmem>>, %arg4: memref<1x8xf32, #tpu.memory_space<vmem>>) attributes {dimension_semantics = [], scalar_prefetch = 0 : i64, scratch_operands = 0 : i64, tpu.core_type = #tpu.core_type<tc>} {
    %c0 = arith.constant 0 : index
    %c0_0 = arith.constant 0 : index
    %0 = vector.load %arg0[%c0, %c0_0] : memref<8x16xf32, #tpu.memory_space<vmem>>, vector<8x16xf32>
    %1 = arith.truncf %0 : vector<8x16xf32> to vector<8x16xbf16>
    %c0_1 = arith.constant 0 : index
    %c0_2 = arith.constant 0 : index
    %2 = vector.load %arg2[%c0_1, %c0_2] : memref<112x64xbf16, #tpu.memory_space<vmem>>, vector<16x64xbf16>
    %c16 = arith.constant 16 : index
    %c0_3 = arith.constant 0 : index
    %3 = vector.load %arg2[%c16, %c0_3] : memref<112x64xbf16, #tpu.memory_space<vmem>>, vector<1x64xbf16>
    %c32 = arith.constant 32 : index
    %c0_4 = arith.constant 0 : index
    %4 = vector.load %arg2[%c32, %c0_4] : memref<112x64xbf16, #tpu.memory_space<vmem>>, vector<64x64xbf16>
    %c96 = arith.constant 96 : index
    %c0_5 = arith.constant 0 : index
    %5 = vector.load %arg2[%c96, %c0_5] : memref<112x64xbf16, #tpu.memory_space<vmem>>, vector<1x64xbf16>
    %c0_6 = arith.constant 0 : index
    %c0_7 = arith.constant 0 : index
    %6 = vector.load %arg3[%c0_6, %c0_7] : memref<8x64xf32, #tpu.memory_space<vmem>>, vector<1x64xf32>
    %c1 = arith.constant 1 : index
    %c0_8 = arith.constant 0 : index
    %7 = vector.load %arg3[%c1, %c0_8] : memref<8x64xf32, #tpu.memory_space<vmem>>, vector<1x64xf32>
    %c2 = arith.constant 2 : index
    %c0_9 = arith.constant 0 : index
    %8 = vector.load %arg3[%c2, %c0_9] : memref<8x64xf32, #tpu.memory_space<vmem>>, vector<1x64xf32>
    %c3 = arith.constant 3 : index
    %c0_10 = arith.constant 0 : index
    %9 = vector.load %arg3[%c3, %c0_10] : memref<8x64xf32, #tpu.memory_space<vmem>>, vector<1x64xf32>
    %c4 = arith.constant 4 : index
    %c0_11 = arith.constant 0 : index
    %10 = vector.load %arg3[%c4, %c0_11] : memref<8x64xf32, #tpu.memory_space<vmem>>, vector<1x64xf32>
    %c5 = arith.constant 5 : index
    %c0_12 = arith.constant 0 : index
    %11 = vector.load %arg3[%c5, %c0_12] : memref<8x64xf32, #tpu.memory_space<vmem>>, vector<1x64xf32>
    %c6 = arith.constant 6 : index
    %c0_13 = arith.constant 0 : index
    %12 = vector.load %arg3[%c6, %c0_13] : memref<8x64xf32, #tpu.memory_space<vmem>>, vector<1x1xf32>
    %cst = arith.constant dense<0.000000e+00> : vector<8x64xf32>
    %13 = tpu.matmul %1, %2, %cst {dimension_numbers = #tpu.dot_dimension_numbers<[1], [0], [0], [1], [0, 0, 1, 1], [], []>} : vector<8x16xbf16>, vector<16x64xbf16>, vector<8x64xf32> -> vector<8x64xf32>
    %c0_14 = arith.constant 0 : index
    %c0_15 = arith.constant 0 : index
    %14 = vector.load %arg1[%c0_14, %c0_15] : memref<8x1xf32, #tpu.memory_space<vmem>>, vector<8x1xf32>
    %15 = arith.extf %3 : vector<1x64xbf16> to vector<1x64xf32>
    %16 = vector.broadcast %14 : vector<8x1xf32> to vector<8x64xf32>
    %17 = vector.broadcast %15 : vector<1x64xf32> to vector<8x64xf32>
    %18 = arith.mulf %16, %17 : vector<8x64xf32>
    %19 = arith.addf %13, %18 : vector<8x64xf32>
    %20 = vector.broadcast %6 : vector<1x64xf32> to vector<8x64xf32>
    %21 = arith.addf %19, %20 : vector<8x64xf32>
    %cst_16 = arith.constant dense<0.000000e+00> : vector<8xf32>
    %22 = vector.multi_reduction <add>, %21, %cst_16 [1] : vector<8x64xf32> to vector<8xf32>
    %23 = vector.shape_cast %22 : vector<8xf32> to vector<8x1xf32>
    %24 = arith.mulf %21, %21 : vector<8x64xf32>
    %cst_17 = arith.constant dense<0.000000e+00> : vector<8xf32>
    %25 = vector.multi_reduction <add>, %24, %cst_17 [1] : vector<8x64xf32> to vector<8xf32>
    %26 = vector.shape_cast %25 : vector<8xf32> to vector<8x1xf32>
    %cst_18 = arith.constant 1.562500e-02 : f32
    %27 = vector.broadcast %cst_18 : f32 to vector<8x1xf32>
    %28 = arith.mulf %23, %27 : vector<8x1xf32>
    %cst_19 = arith.constant 1.562500e-02 : f32
    %29 = vector.broadcast %cst_19 : f32 to vector<8x1xf32>
    %30 = arith.mulf %26, %29 : vector<8x1xf32>
    %31 = arith.mulf %28, %28 : vector<8x1xf32>
    %32 = arith.subf %30, %31 : vector<8x1xf32>
    %cst_20 = arith.constant 0.000000e+00 : f32
    %33 = vector.broadcast %cst_20 : f32 to vector<8x1xf32>
    %34 = arith.maximumf %32, %33 : vector<8x1xf32>
    %35 = vector.broadcast %28 : vector<8x1xf32> to vector<8x64xf32>
    %36 = arith.subf %21, %35 : vector<8x64xf32>
    %cst_21 = arith.constant 9.99999974E-6 : f32
    %37 = vector.broadcast %cst_21 : f32 to vector<8x1xf32>
    %38 = arith.addf %34, %37 : vector<8x1xf32>
    %39 = math.rsqrt %38 : vector<8x1xf32>
    %40 = vector.broadcast %39 : vector<8x1xf32> to vector<8x64xf32>
    %41 = arith.mulf %36, %40 : vector<8x64xf32>
    %42 = vector.broadcast %7 : vector<1x64xf32> to vector<8x64xf32>
    %43 = arith.mulf %41, %42 : vector<8x64xf32>
    %44 = vector.broadcast %8 : vector<1x64xf32> to vector<8x64xf32>
    %45 = arith.addf %43, %44 : vector<8x64xf32>
    %cst_22 = arith.constant 0.000000e+00 : f32
    %46 = vector.broadcast %cst_22 : f32 to vector<8x64xf32>
    %47 = arith.maximumf %45, %46 : vector<8x64xf32>
    %48 = arith.truncf %47 : vector<8x64xf32> to vector<8x64xbf16>
    %cst_23 = arith.constant dense<0.000000e+00> : vector<8x64xf32>
    %49 = tpu.matmul %48, %4, %cst_23 {dimension_numbers = #tpu.dot_dimension_numbers<[1], [0], [0], [1], [0, 0, 1, 1], [], []>} : vector<8x64xbf16>, vector<64x64xbf16>, vector<8x64xf32> -> vector<8x64xf32>
    %50 = vector.broadcast %9 : vector<1x64xf32> to vector<8x64xf32>
    %51 = arith.addf %49, %50 : vector<8x64xf32>
    %cst_24 = arith.constant dense<0.000000e+00> : vector<8xf32>
    %52 = vector.multi_reduction <add>, %51, %cst_24 [1] : vector<8x64xf32> to vector<8xf32>
    %53 = vector.shape_cast %52 : vector<8xf32> to vector<8x1xf32>
    %54 = arith.mulf %51, %51 : vector<8x64xf32>
    %cst_25 = arith.constant dense<0.000000e+00> : vector<8xf32>
    %55 = vector.multi_reduction <add>, %54, %cst_25 [1] : vector<8x64xf32> to vector<8xf32>
    %56 = vector.shape_cast %55 : vector<8xf32> to vector<8x1xf32>
    %cst_26 = arith.constant 1.562500e-02 : f32
    %57 = vector.broadcast %cst_26 : f32 to vector<8x1xf32>
    %58 = arith.mulf %53, %57 : vector<8x1xf32>
    %cst_27 = arith.constant 1.562500e-02 : f32
    %59 = vector.broadcast %cst_27 : f32 to vector<8x1xf32>
    %60 = arith.mulf %56, %59 : vector<8x1xf32>
    %61 = arith.mulf %58, %58 : vector<8x1xf32>
    %62 = arith.subf %60, %61 : vector<8x1xf32>
    %cst_28 = arith.constant 0.000000e+00 : f32
    %63 = vector.broadcast %cst_28 : f32 to vector<8x1xf32>
    %64 = arith.maximumf %62, %63 : vector<8x1xf32>
    %65 = vector.broadcast %58 : vector<8x1xf32> to vector<8x64xf32>
    %66 = arith.subf %51, %65 : vector<8x64xf32>
    %cst_29 = arith.constant 9.99999974E-6 : f32
    %67 = vector.broadcast %cst_29 : f32 to vector<8x1xf32>
    %68 = arith.addf %64, %67 : vector<8x1xf32>
    %69 = math.rsqrt %68 : vector<8x1xf32>
    %70 = vector.broadcast %69 : vector<8x1xf32> to vector<8x64xf32>
    %71 = arith.mulf %66, %70 : vector<8x64xf32>
    %72 = vector.broadcast %10 : vector<1x64xf32> to vector<8x64xf32>
    %73 = arith.mulf %71, %72 : vector<8x64xf32>
    %74 = vector.broadcast %11 : vector<1x64xf32> to vector<8x64xf32>
    %75 = arith.addf %73, %74 : vector<8x64xf32>
    %cst_30 = arith.constant 0.000000e+00 : f32
    %76 = vector.broadcast %cst_30 : f32 to vector<8x64xf32>
    %77 = arith.maximumf %75, %76 : vector<8x64xf32>
    %78 = arith.truncf %77 : vector<8x64xf32> to vector<8x64xbf16>
    %cst_31 = arith.constant dense<0.000000e+00> : vector<1x8xf32>
    %79 = tpu.matmul %5, %78, %cst_31 {dimension_numbers = #tpu.dot_dimension_numbers<[1], [1], [0], [0], [0, 0, 1, 0], [], []>} : vector<1x64xbf16>, vector<8x64xbf16>, vector<1x8xf32> -> vector<1x8xf32>
    %80 = vector.broadcast %12 : vector<1x1xf32> to vector<1x8xf32>
    %81 = arith.addf %79, %80 : vector<1x8xf32>
    %c0_32 = arith.constant 0 : index
    %c0_33 = arith.constant 0 : index
    %82 = vector.load %arg4[%c0_32, %c0_33] : memref<1x8xf32, #tpu.memory_space<vmem>>, vector<1x8xf32>
    tpu.vector_store %arg4[%c0_32, %c0_33], %81 {strides = array<i32>} : memref<1x8xf32, #tpu.memory_space<vmem>>, vector<1x8xf32>,
    return
  }
}

</mosaic_0001>

<bundles_post_ra>
// kernel: tpu_custom_call.1
= control target key start
LH: loop header
LB: loop body
LE: loop exit
PB: predicated region body
PF: predicated region fallthrough
CT: control target
= control target key end

     0   :  { %v388_v1 = vmov 0.0   ;;  %vm389_vm0 = vmmov 0   ;;  %vm58_vm1 = vcmask 130048   ;;  %v390_v5 = vmov 0   ;;  %s484_s0 = inlined_call_operand.vmem [shape: f32[8,16], index: 0, kind: input, shape index: {}]   ;;  %s485_s1 = inlined_call_operand.vmem [shape: f32[8,1], index: 1, kind: input, shape index: {}]   ;;  %s486_s2 = inlined_call_operand.vmem [shape: bf16[112,64], index: 2, kind: input, shape index: {}]   ;;  %s487_s3 = inlined_call_operand.vmem [shape: f32[8,64], index: 3, kind: input, shape index: {}]   ;;  %s488_s4 = inlined_call_operand.hbm [shape: f32[1,8], index: 4, kind: output, shape index: {}]  }
   0x1   :  { %v355_v0 = vld [vmem:[%s486_s2] sm:$0xff]   ;;  %325 = vmatprep.subr.bf16.mxu0 %v388_v1  ;;  %331 = vmatprep.subr.bf16.mxu1 %v388_v1 }
   0x2   :  { %v19_v2 = vld [vmem:[%s484_s0] sm:$0xff]  ;;  %326 = vmatpush3.bf16.msra.mxu0 %v355_v0  ;;  %327 = vmatprep.mubr.msk.bf16.mxu0 %vm389_vm0, %v388_v1 }
   0x3   :  { %v40_v3 = vld [vmem:[%s485_s1] sm:$0xff]  ;;  %v20_v4 = vpack.c.bf16 %v19_v2, %v19_v2  ;;  %353 = vset.pattern.permute.xlu0 %v390_v5  ;;  %339 = vmatprep.mubr.msk.bf16.mxu1 %vm389_vm0, %v388_v1 }
   0x4   :  { %44 = vperm.xlu0 %353, %v40_v3   ;;  %343 = vmatprep.subr.bf16.mxu0 %v388_v1 }
   0x5   :  { %328 = vmatmul.mubr.msk.bf16.vlgmr.msra.gmra.mrb[0].mxu0 %vm58_vm1, %v20_v4  ;;  %354 = vset.pattern.permute.xlu1 %v390_v5 }
   0x6   :  { %345 = vmatprep.mubr.msk.bf16.mxu0 %vm389_vm0, %v388_v1 }
   0x7   :  { %9 = vsyncpa [#allocation3], 0  ;;  %v47_v6 = vlaneseq  ;;  %v23_v8 = vld [vmem:[%s486_s2 + $0x8] sm:$0x1]  ;;  %v304_v14 = vld [vmem:[%s487_s3] ss:$0 sm:$0xff] }
   0x8   :  { %v41_v10 = vunpack.c.l.bf16 %v23_v8  ;;  %vm107_vm2 = vcmask 523264   ;;  %v356_v24 = vld [vmem:[%s486_s2 + $0x10] sm:$0xff]   ;;  %v357_v25 = vld [vmem:[%s486_s2 + $0x18] sm:$0xff]   ;;  %v358_v26 = vld [vmem:[%s486_s2 + $0x20] sm:$0xff]   ;;  %s391_s19 = smov [#allocation2]   ;;  %vm286_vm3 = vcmask 57344  }
   0x9   :  { %v48_v7 = vshrl.u32 %v47_v6, 7  ;;  %332 = vmatpush3.bf16.msra.mxu1 %v356_v24  ;;  %v359_v27 = vld [vmem:[%s486_s2 + $0x28] sm:$0xff]   ;;  %v305_v38 = vld [vmem:[%s487_s3 + $0x1] ss:$0 sm:$0xff]  ;;  %v306_v40 = vld [vmem:[%s487_s3 + $0x2] ss:$0 sm:$0xff] }
   0xa   :  { %333 = vmatprep.subr.bf16.mxu1 %v388_v1  ;;  %v307_v45 = vld [vmem:[%s487_s3 + $0x3] ss:$0 sm:$0xff]  ;;  %v39_v54 = vld [vmem:[%s487_s3 + $0x6] sm:$0x1]  ;;  %v314_v3 = vld [vmem:[%s487_s3 + $0x5] ss:$0 sm:$0xff] }
   0xb   :  { %v49_v9 = vsub.s32 0, %v48_v7  ;;  %s294_s20 = sshll.u32 %s391_s19, 4  ;;  %s295_s20 = int_to_ptr.vmem [resolvable:$true] %s294_s20 }
   0xc   :  { %s368_s0 = scalar_lea.vmem %s295_s20, 32  ;;  %p369_p1 = scmp.lt.s32.totalorder %s295_s20, %s295_s20 }
   0xd   :  { %v50_v11 = vrot.slane %v41_v10, %v49_v9  ;;  %334 = vmatpush3.bf16.msra.mxu1 %v357_v25  ;;  %v32_v9 = vld [vmem:[%s486_s2 + $0x30] sm:$0x1] }
   0xe   :  { %335 = vmatprep.subr.bf16.mxu1 %v388_v1 }
  0x11   :  { %336 = vmatpush3.bf16.msra.mxu1 %v358_v26 }
  0x12   :  { %337 = vmatprep.subr.bf16.mxu1 %v388_v1  ;;  %v313_v1 = vld [vmem:[%s487_s3 + $0x4] ss:$0 sm:$0xff]  ;;  %s364_s3 = scalar_lea.vmem %s295_s20, 16 }
  0x13   :  { %p365_p0 = scmp.ne.s32.totalorder %s295_s20, %s364_s3  ;;  %p370_p2 = scmp.lt.s32.totalorder %s368_s0, %s364_s3 }
  0x15   :  { %338 = vmatpush3.bf16.msra.mxu1 %v359_v27  ;;  %p371_p3 = por %p370_p2, %p369_p1 }
  0x17   :  { %p372_p4 = pnand %p371_p3, %p365_p0 }
  0x83   :  { %v45_v12 = vpop.permute.xlu0 %44 }
  0x84   :  { %v51_v13 = vmul.f32 %v50_v11, %v45_v12 }
  0xd8   :  { %v96_v15 = vpop.f32.mrb[0].mxu0 }
  0xd9   :  { %v97_v16 = vadd.f32 %v96_v15, %v51_v13  ;;  %v329_v17 = vpop.f32.mrb[1].mxu0 }
  0xda   :  { %v99_v18 = vpop.f32.mrb[2].mxu0 }
  0xdb   :  { %v106_v19 = vadd.f32 %v304_v14, %v97_v16  ;;  %v330_v20 = vpop.f32.mrb[3].mxu0 }
  0xdd   :  { %v108_v21 = vsel %vm107_vm2, %v106_v19, 0.0  ;;  %v111_v22 = vmul.f32 %v106_v19, %v106_v19 }
  0xde   :  { %109 = vadd.xlane.f32.xlu0 %v108_v21 }
  0xdf   :  { %v112_v23 = vsel %vm107_vm2, %v111_v22, 0.0 }
  0xe0   :  { %113 = vadd.xlane.f32.xlu1 %v112_v23 }
 0x16b   :  { %v110_v28 = vpop.xlane.xlu0 %109 }
 0x16c   :  { %v115_v29 = vmul.f32 0.015625, %v110_v28 }
 0x16d   :  { %v114_v30 = vpop.xlane.xlu1 %113 }
 0x16e   :  { %v117_v31 = vmul.f32 %v115_v29, %v115_v29  ;;  %v116_v32 = vmul.f32 0.015625, %v114_v30  ;;  %v120_v36 = vsub.f32 %v106_v19, %v115_v29 }
 0x170   :  { %v118_v33 = vsub.f32 %v116_v32, %v117_v31 }
 0x172   :  { %v119_v34 = vmax.f32 %v118_v33, 0.0 }
 0x174   :  { %v121_v35 = vadd.f32 1e-05, %v119_v34 }
 0x176   :  { %360 = vrsqrt.f32 %v121_v35 }
 0x180   :  { %v361_v37 = vpop.eup %360 }
 0x181   :  { %v123_v39 = vmul.f32 %v361_v37, %v120_v36 }
 0x183   :  { %v128_v41 = vmul.f32 %v305_v38, %v123_v39 }
 0x185   :  { %v133_v42 = vadd.f32 %v306_v40, %v128_v41 }
 0x187   :  { %v134_v43 = vmax.f32 %v133_v42, 0.0 }
 0x189   :  { %v135_v44 = vpack.c.bf16 %v134_v43, %v134_v43 }
 0x18b   :  { %340 = vmatmul.mubr.msk.bf16.vlgmr.msra.gmra.mrb[0].mxu1 %vm107_vm2, %v135_v44 }
 0x25e   :  { %v201_v46 = vpop.f32.mrb[0].mxu1 }
 0x25f   :  { %v202_v47 = vadd.f32 %v307_v45, %v201_v46  ;;  %v341_v48 = vpop.f32.mrb[1].mxu1 }
 0x260   :  { %v204_v49 = vpop.f32.mrb[2].mxu1 }
 0x261   :  { %v342_v50 = vpop.f32.mrb[3].mxu1  ;;  %v207_v51 = vsel %vm107_vm2, %v202_v47, 0.0  ;;  %v210_v52 = vmul.f32 %v202_v47, %v202_v47 }
 0x262   :  { %208 = vadd.xlane.f32.xlu1 %v207_v51 }
 0x263   :  { %v211_v53 = vsel %vm107_vm2, %v210_v52, 0.0 }
 0x266   :  { %212 = vadd.xlane.f32.xlu1 %v211_v53 }
 0x277   :  { %237 = vperm.xlu1 %354, %v39_v54  }
 0x2ef   :  { %v209_v55 = vpop.xlane.xlu1 %208 }
 0x2f0   :  { %v214_v56 = vmul.f32 0.015625, %v209_v55 }
 0x2f2   :  { %v216_v58 = vmul.f32 %v214_v56, %v214_v56  ;;  %v219_v63 = vsub.f32 %v202_v47, %v214_v56 }
 0x2f3   :  { %v213_v57 = vpop.xlane.xlu1 %212 }
 0x2f4   :  { %v215_v59 = vmul.f32 0.015625, %v213_v57 }
 0x2f6   :  { %v217_v60 = vsub.f32 %v215_v59, %v216_v58 }
 0x2f7   :  { %v238_v10 = vpop.permute.xlu1 %237 }
 0x2f8   :  { %v218_v61 = vmax.f32 %v217_v60, 0.0 }
 0x2fa   :  { %v220_v62 = vadd.f32 1e-05, %v218_v61 }
 0x2fc   :  { %362 = vrsqrt.f32 %v220_v62 }
 0x306   :  { %v363_v0 = vpop.eup %362 }
 0x307   :  { %v222_v2 = vmul.f32 %v363_v0, %v219_v63 }
 0x309   :  { %v227_v4 = vmul.f32 %v313_v1, %v222_v2 }
 0x30b   :  { %v232_v5 = vadd.f32 %v314_v3, %v227_v4 }
 0x30d   :  { %v233_v6 = vmax.f32 %v232_v5, 0.0 }
 0x30f   :  { %v234_v7 = vpack.c.bf16 %v233_v6, %v233_v6 }
 0x311   :  { %v244_v8 = vsel %vm107_vm2, %v234_v7, 0 }
 0x312   :  { %344 = vmatpush3.bf16.xpose.msra.mxu0 %v244_v8 }
 0x319   :  { %346 = vmatmul.mubr.msk.bf16.vlgmr.msra.gmra.mrb[4].mxu0 %vm107_vm2, %v32_v9 }
 0x3ec   :  { %v280_v11 = vpop.f32.mrb[4].mxu0 }
 0x3ed   :  { %v281_v12 = vadd.f32 %v280_v11, %v238_v10  ;;  %v347_v13 = vpop.f32.mrb[5].mxu0 }
 0x3ee   :  { %v283_v14 = vpop.f32.mrb[6].mxu0 }
 0x3ef   :  { %v348_v15 = vpop.f32.mrb[7].mxu0  ;;  %287 = vst.msk [vmem:[#allocation2] sm:$0x1] %vm286_vm3, %v281_v12 }
 0x3f0   :  { %375 = shalt.err (!%p372_p4)
}
 0x3f1   :  { %s376_s1 = scalar_lea.hbm %s488_s4, 16 }
 0x3f2   :  { %p377_p5 = scmp.ne.s32.totalorder %s488_s4, %s376_s1  ;;  %p380_p6 = scmp.lt.u32.totalorder %s376_s1, %s488_s4 }
 0x3f4   :  { %p382_p7 = pnand %p380_p6, %p377_p5 }
 0x3f6   :  { %385 = shalt.err (!%p382_p7)
}
 0x3f7   :  { %297 = dma.vmem_to_hbm [thread:$0]  %s295_s20, 16, %s488_s4, [#allocation3]  }
 0x3f8   :  { %386 = dma.done.wait [#allocation3], 16  }
 0x3f9   :  { %387 = vsyncadd [#allocation3], 4294967280 }
 0x3fa   :  { %301 = vsyncpa [#allocation3], 1 }

</bundles_post_ra>
